<compile_context>
chip_gen: v7x
topology: tpu7x:2x2x1
jax: 0.10.0
libtpu: 0.0.40
codegen_flags: <defaults>
</compile_context>

<pallas_src>
import jax
import jax.numpy as jnp
from jax.experimental import pallas as pl
from jax.experimental.pallas import tpu as pltpu

BIN_ALPHA = 1.0
LN_EPS = 1e-5
MAX_ROW_TILE = 512                  # safe for v7x's 64 MiB VMEM
VMEM_LIMIT = 64 * 1024 * 1024       # explicit scoped-VMEM budget (v5e default is 16 MiB)


# ----------------------------- helpers -----------------------------

def _round_up(x, m):
    return ((x + m - 1) // m) * m


def _linear_row_tile():
    # v6e (128 MiB VMEM): HBM-bound linears can take TM=1024; keep 512 elsewhere.
    try:
        kind = jax.devices()[0].device_kind.lower()
        if "v6" in kind:
            return 1024
    except Exception:
        pass
    return MAX_ROW_TILE


MAX_LINEAR_ROW_TILE = _linear_row_tile()


def _row_tiling(M, max_tile):
    """Return (tile_m, M_padded); tile_m multiple of 8, >=2 grid steps (megacore)."""
    if M <= 8:
        return 8, 8
    if M <= 2 * max_tile:
        t = _round_up(-(-M // 2), 8)
        return t, 2 * t
    return max_tile, _round_up(M, max_tile)


def _pad_rows(x, m_pad):
    M = x.shape[0]
    if m_pad == M:
        return x
    pad = [(0, m_pad - M)] + [(0, 0)] * (x.ndim - 1)
    return jnp.pad(x, pad)


def _cparams(n_parallel):
    return pltpu.CompilerParams(
        dimension_semantics=("parallel",) * n_parallel,
        vmem_limit_bytes=VMEM_LIMIT)


def _probe_kernel(w_ref, o_ref):
    o_ref[...] = w_ref[...] * 2.0


def _probe_single_buffer():
    """Check pipeline_mode=pl.Buffered(1) support; fall back to default buffering."""
    try:
        spec = pl.BlockSpec((8, 128), lambda i: (0, 0), pipeline_mode=pl.Buffered(1))
        f = pl.pallas_call(
            _probe_kernel,
            out_shape=jax.ShapeDtypeStruct((8, 128), jnp.float32),
            grid=(1,),
            in_specs=[spec],
            out_specs=pl.BlockSpec((8, 128), lambda i: (0, 0)),
        )
        jax.block_until_ready(f(jnp.ones((8, 128), jnp.float32)))
        return True
    except Exception:
        return False


_USE_SINGLE_BUFFER = _probe_single_buffer()


def _const_spec(shape):
    """Grid-invariant operand (weights / biases / LN params): single-buffer it."""
    idx = lambda *_: (0,) * len(shape)
    if _USE_SINGLE_BUFFER:
        return pl.BlockSpec(shape, idx, pipeline_mode=pl.Buffered(1))
    return pl.BlockSpec(shape, idx)


# ----------------------------- Pallas kernels -----------------------------

def _linear_kernel(x_ref, w_ref, b_ref, o_ref):
    y = jnp.dot(x_ref[...].astype(jnp.bfloat16), w_ref[...],
                preferred_element_type=jnp.float32) + b_ref[...]
    o_ref[...] = y.astype(o_ref.dtype)


def _qkv_kernel(x_ref, w_ref, b_ref, q_ref, k_ref, v_ref):
    # one fused [D, 3D] matmul; Q/K/V emitted as three separate [TM, D] outputs
    y = jnp.dot(x_ref[...].astype(jnp.bfloat16), w_ref[...],
                preferred_element_type=jnp.float32) + b_ref[...]
    D = q_ref.shape[-1]
    q_ref[...] = y[:, :D].astype(q_ref.dtype)
    k_ref[...] = y[:, D:2 * D].astype(k_ref.dtype)
    v_ref[...] = y[:, 2 * D:].astype(v_ref.dtype)


def _linear_res_ln_kernel(x_ref, w_ref, b_ref, r_ref, g_ref, bb_ref, o_ref):
    # y = LN(residual + x @ W + b); stats in f32
    y = jnp.dot(x_ref[...].astype(jnp.bfloat16), w_ref[...],
                preferred_element_type=jnp.float32) + b_ref[...]
    y = y + r_ref[...].astype(jnp.float32)
    mu = jnp.mean(y, axis=-1, keepdims=True)
    var = jnp.mean((y - mu) ** 2, axis=-1, keepdims=True)
    o_ref[...] = ((y - mu) * jax.lax.rsqrt(var + LN_EPS) * g_ref[...]
                  + bb_ref[...]).astype(o_ref.dtype)


def _ffn_res_ln_kernel(x_ref, w1_ref, b1_ref, w2_ref, b2_ref, g_ref, bb_ref, o_ref):
    # y = LN(x + relu(x@W1+b1) @ W2 + b2); the [M,FF] intermediate never hits HBM
    x = x_ref[...]
    h = jnp.dot(x.astype(jnp.bfloat16), w1_ref[...],
                preferred_element_type=jnp.float32) + b1_ref[...]
    h = jnp.maximum(h, 0.0)
    y = x.astype(jnp.float32) + jnp.dot(h.astype(jnp.bfloat16), w2_ref[...],
                                        preferred_element_type=jnp.float32) + b2_ref[...]
    mu = jnp.mean(y, axis=-1, keepdims=True)
    var = jnp.mean((y - mu) ** 2, axis=-1, keepdims=True)
    o_ref[...] = ((y - mu) * jax.lax.rsqrt(var + LN_EPS) * g_ref[...]
                  + bb_ref[...]).astype(o_ref.dtype)


def _ln_final_kernel(x_ref, g_ref, b_ref, w_ref, bias_ref, o_ref):
    # LayerNorm fused with the D->1 to_final projection (lane reduction).
    x = x_ref[...].astype(jnp.float32)
    mu = jnp.mean(x, axis=-1, keepdims=True)
    var = jnp.mean((x - mu) ** 2, axis=-1, keepdims=True)
    xn = (x - mu) * jax.lax.rsqrt(var + LN_EPS) * g_ref[...] + b_ref[...]
    o_ref[...] = jnp.sum(xn * w_ref[...], axis=-1, keepdims=True) + bias_ref[...]


def _token_emb_kernel(x_ref, w1_ref, b1_ref, w2_ref, b2_ref, pb_ref, emb_ref, o_ref):
    # AutoDiscretization-style continuous-value embedding; bins padded to 128
    # lanes with an explicit additive mask (pb_ref) before the softmax.
    x = x_ref[...]                                     # [TM, 1] f32
    h = x * w1_ref[...] + b1_ref[...]                  # [TM, bins_p]
    h = jnp.where(h > 0, h, 0.1 * h)                   # LeakyReLU(0.1)
    h2 = jnp.dot(h.astype(jnp.bfloat16), w2_ref[...],
                 preferred_element_type=jnp.float32) + b2_ref[...]
    z = BIN_ALPHA * h + h2 + pb_ref[...]               # mask padded bins
    z = z - jnp.max(z, axis=-1, keepdims=True)
    p = jnp.exp(z)
    p = p / jnp.sum(p, axis=-1, keepdims=True)         # exact normalization
    o_ref[...] = jnp.dot(p.astype(jnp.bfloat16), emb_ref[...],
                         preferred_element_type=jnp.float32).astype(o_ref.dtype)


# ----------------------------- wrappers -----------------------------

def linear(x, w, b, out_dtype=jnp.bfloat16):
    M, K = x.shape
    N = w.shape[1]
    tile_m, m_pad = _row_tiling(M, MAX_LINEAR_ROW_TILE)
    out = pl.pallas_call(
        _linear_kernel,
        out_shape=jax.ShapeDtypeStruct((m_pad, N), out_dtype),
        grid=(m_pad // tile_m,),
        in_specs=[pl.BlockSpec((tile_m, K), lambda i: (i, 0)),
                  _const_spec((K, N)),
                  _const_spec((1, N))],
        out_specs=pl.BlockSpec((tile_m, N), lambda i: (i, 0)),
        compiler_params=_cparams(1),
    )(_pad_rows(x, m_pad), w, b)
    return out[:M]


def qkv_linear(x, wqkv, bqkv):
    # fused QKV projection with three [M, D] bf16 outputs (no post-hoc slicing)
    M, K = x.shape
    D = wqkv.shape[1] // 3
    tile_m, m_pad = _row_tiling(M, MAX_LINEAR_ROW_TILE)
    row_spec = pl.BlockSpec((tile_m, D), lambda i: (i, 0))
    q, k, v = pl.pallas_call(
        _qkv_kernel,
        out_shape=tuple(jax.ShapeDtypeStruct((m_pad, D), jnp.bfloat16)
                        for _ in range(3)),
        grid=(m_pad // tile_m,),
        in_specs=[pl.BlockSpec((tile_m, K), lambda i: (i, 0)),
                  _const_spec((K, 3 * D)),
                  _const_spec((1, 3 * D))],
        out_specs=(row_spec, row_spec, row_spec),
        compiler_params=_cparams(1),
    )(_pad_rows(x, m_pad), wqkv, bqkv)
    return q[:M], k[:M], v[:M]


def linear_res_ln(x, w, b, residual, g, bb, out_dtype=jnp.bfloat16):
    M, K = x.shape
    N = w.shape[1]
    tile_m, m_pad = _row_tiling(M, MAX_LINEAR_ROW_TILE)
    out = pl.pallas_call(
        _linear_res_ln_kernel,
        out_shape=jax.ShapeDtypeStruct((m_pad, N), out_dtype),
        grid=(m_pad // tile_m,),
        in_specs=[pl.BlockSpec((tile_m, K), lambda i: (i, 0)),
                  _const_spec((K, N)),
                  _const_spec((1, N)),
                  pl.BlockSpec((tile_m, N), lambda i: (i, 0)),
                  _const_spec((1, N)),
                  _const_spec((1, N))],
        out_specs=pl.BlockSpec((tile_m, N), lambda i: (i, 0)),
        compiler_params=_cparams(1),
    )(_pad_rows(x, m_pad), w, b, _pad_rows(residual, m_pad), g, bb)
    return out[:M]


def ffn_res_ln(x, w1, b1, w2, b2, g, bb, out_dtype=jnp.bfloat16):
    M, D = x.shape
    F = w1.shape[1]
    tile_m, m_pad = _row_tiling(M, MAX_ROW_TILE)
    out = pl.pallas_call(
        _ffn_res_ln_kernel,
        out_shape=jax.ShapeDtypeStruct((m_pad, D), out_dtype),
        grid=(m_pad // tile_m,),
        in_specs=[pl.BlockSpec((tile_m, D), lambda i: (i, 0)),
                  _const_spec((D, F)), _const_spec((1, F)),
                  _const_spec((F, D)), _const_spec((1, D)),
                  _const_spec((1, D)), _const_spec((1, D))],
        out_specs=pl.BlockSpec((tile_m, D), lambda i: (i, 0)),
        compiler_params=_cparams(1),
    )(_pad_rows(x, m_pad), w1, b1, w2, b2, g, bb)
    return out[:M]


def ln_to_final(x, g, b, w, bias):
    M, D = x.shape
    tile_m, m_pad = _row_tiling(M, MAX_ROW_TILE)
    out = pl.pallas_call(
        _ln_final_kernel,
        out_shape=jax.ShapeDtypeStruct((m_pad, 1), jnp.float32),
        grid=(m_pad // tile_m,),
        in_specs=[pl.BlockSpec((tile_m, D), lambda i: (i, 0)),
                  _const_spec((1, D)), _const_spec((1, D)),
                  _const_spec((1, D)), _const_spec((1, 1))],
        out_specs=pl.BlockSpec((tile_m, 1), lambda i: (i, 0)),
        compiler_params=_cparams(1),
    )(_pad_rows(x, m_pad), g, b, w, bias)
    return out[:M]


def token_emb(values, tp):
    # values: [B, L] continuous expression values -> [B, L, D] bf16
    # TODO(synk): mask/pad special-token embedding replacement of
    # AutoDiscretizationEmbedding2 is not modeled (no mask tokens in this path).
    B, L = values.shape
    bins_p, D = tp['emb'].shape
    M = B * L
    tile_m, m_pad = _row_tiling(M, MAX_ROW_TILE)
    x = _pad_rows(values.reshape(M, 1).astype(jnp.float32), m_pad)
    out = pl.pallas_call(
        _token_emb_kernel,
        out_shape=jax.ShapeDtypeStruct((m_pad, D), jnp.bfloat16),
        grid=(m_pad // tile_m,),
        in_specs=[pl.BlockSpec((tile_m, 1), lambda i: (i, 0)),
                  _const_spec((1, bins_p)), _const_spec((1, bins_p)),
                  _const_spec((bins_p, bins_p)), _const_spec((1, bins_p)),
                  _const_spec((1, bins_p)), _const_spec((bins_p, D))],
        out_specs=pl.BlockSpec((tile_m, D), lambda i: (i, 0)),
        compiler_params=_cparams(1),
    )(x, tp['w1'], tp['b1'], tp['w2'], tp['b2'], tp['padbias'], tp['emb'])
    return out[:M].reshape(B, L, D)


def mha_attention(q, k, v, key_bias, H):
    """Multi-head attention on head-interleaved [B, L, D] tensors.

    No head split/merge transposes: BlockSpecs slice head groups (G*Dh lanes)
    out of the last dim and write O back in the same layout.  K/V are
    VMEM-resident per (batch, head-group); kv tiles iterate inside the kernel.
    The 1/sqrt(Dh) scale is pre-folded into Wq.  key_bias: [B,1,L] additive
    (-1e9 on padded keys).
    """
    B, L, D = q.shape
    Dh = D // H

    # smallest head group G with H % G == 0 and lane-dense (G*Dh) % 128 == 0,
    # else all heads in one block (block == full D -> always legal).
    G = H
    for g in range(1, H + 1):
        if H % g == 0 and (g * Dh) % 128 == 0:
            G = g
            break
    n_groups = H // G
    GD = G * Dh

    # 128/512-aligned sequence padding (MXU + lane-dense stores)
    if L <= 2048:
        Lp = max(128, _round_up(L, 128))
        TKV = Lp                         # single-shot softmax over resident K/V
    else:
        Lp = _round_up(L, 512)
        TKV = 512                        # online softmax over resident K/V chunks
    TQ = 128
    n_kv = Lp // TKV

    if Lp != L:
        pad = Lp - L
        q = jnp.pad(q, ((0, 0), (0, pad), (0, 0)))
        k = jnp.pad(k, ((0, 0), (0, pad), (0, 0)))
        v = jnp.pad(v, ((0, 0), (0, pad), (0, 0)))
        key_bias = jnp.pad(key_bias, ((0, 0), (0, 0), (0, pad)),
                           constant_values=-1e9)

    def kernel(q_ref, k_ref, v_ref, b_ref, o_ref):
        for h in range(G):                           # static unroll over heads in group
            lo = h * Dh
            qh = q_ref[0, :, lo:lo + Dh].astype(jnp.bfloat16)          # [TQ, Dh]
            if n_kv == 1:
                kh = k_ref[0, :, lo:lo + Dh].astype(jnp.bfloat16)      # [Lp, Dh]
                vh = v_ref[0, :, lo:lo + Dh].astype(jnp.bfloat16)
                s = jax.lax.dot_general(qh, kh, (((1,), (1,)), ((), ())),
                                        preferred_element_type=jnp.float32)
                s = s + b_ref[0]                                       # [TQ,Lp]+[1,Lp]
                m = jnp.max(s, axis=-1, keepdims=True)
                p = jnp.exp(s - m)
                acc = jnp.dot(p.astype(jnp.bfloat16), vh,
                              preferred_element_type=jnp.float32)
                out = acc / jnp.sum(p, axis=-1, keepdims=True)
            else:
                def body(i, carry):
                    m_p, l_p, acc_p = carry
                    off = pl.multiple_of(i * TKV, TKV)
                    kh = k_ref[0, pl.ds(off, TKV), lo:lo + Dh].astype(jnp.bfloat16)
                    vh = v_ref[0, pl.ds(off, TKV), lo:lo + Dh].astype(jnp.bfloat16)
                    s = jax.lax.dot_general(qh, kh, (((1,), (1,)), ((), ())),
                                            preferred_element_type=jnp.float32)
                    s = s + b_ref[0, :, pl.ds(off, TKV)]
                    m_n = jnp.maximum(m_p, jnp.max(s, axis=-1, keepdims=True))
                    alpha = jnp.exp(m_p - m_n)
                    p = jnp.exp(s - m_n)
                    l_n = alpha * l_p + jnp.sum(p, axis=-1, keepdims=True)
                    acc_n = alpha * acc_p + jnp.dot(
                        p.astype(jnp.bfloat16), vh,
                        preferred_element_type=jnp.float32)
                    return m_n, l_n, acc_n

                m0 = jnp.full((TQ, 1), -jnp.inf, jnp.float32)
                l0 = jnp.zeros((TQ, 1), jnp.float32)
                a0 = jnp.zeros((TQ, Dh), jnp.float32)
                _, l_f, acc = jax.lax.fori_loop(0, n_kv, body, (m0, l0, a0))
                out = acc / l_f
            o_ref[0, :, lo:lo + Dh] = out.astype(o_ref.dtype)

    q_spec = pl.BlockSpec((1, TQ, GD),
                          lambda bg, qi: (bg // n_groups, qi, bg % n_groups))
    kv_spec = pl.BlockSpec((1, Lp, GD),
                           lambda bg, qi: (bg // n_groups, 0, bg % n_groups))
    b_spec = pl.BlockSpec((1, 1, Lp), lambda bg, qi: (bg // n_groups, 0, 0))

    out = pl.pallas_call(
        kernel,
        out_shape=jax.ShapeDtypeStruct((B, Lp, D), jnp.bfloat16),
        grid=(B * n_groups, Lp // TQ),
        in_specs=[q_spec, kv_spec, kv_spec, b_spec],
        out_specs=q_spec,
        compiler_params=pltpu.CompilerParams(
            dimension_semantics=("parallel", "parallel"),
            vmem_limit_bytes=VMEM_LIMIT),
    )(q, k, v, key_bias)
    return out[:, :L, :]


# ----------------------------- model pieces -----------------------------

def transformer_layer(x, pad_mask, p):
    # post-norm transformer encoder layer (self-attn + FFN) with key padding mask
    B, L, D = x.shape
    H = p['heads']
    xf = x.reshape(B * L, D)

    q, k, v = qkv_linear(xf, p['wqkv'], p['bqkv'])               # 3x [B*L, D] bf16
    q = q.reshape(B, L, D)
    k = k.reshape(B, L, D)
    v = v.reshape(B, L, D)
    key_bias = jnp.where(pad_mask, -1e9, 0.0).astype(jnp.float32).reshape(B, 1, L)
    o = mha_attention(q, k, v, key_bias, H)                      # [B, L, D] bf16

    # out-projection + residual + LayerNorm fused in one kernel
    x2 = linear_res_ln(o.reshape(B * L, D), p['wo'], p['bo'], xf,
                       p['ln1_g'], p['ln1_b'])
    # FFN (two matmuls) + residual + LayerNorm fused in one kernel
    x3 = ffn_res_ln(x2, p['w_ff1'], p['b_ff1'], p['w_ff2'], p['b_ff2'],
                    p['ln2_g'], p['ln2_b'])
    return x3.reshape(B, L, D)


def scatter_encoder_outputs(dec_emb, enc_out, padding_label, encoder_labels):
    # torch: batch_idx, gen_idx = (encoder_labels == True).nonzero(as_tuple=True)
    #        decoder_data[batch_idx, gen_idx] = x[~padding_label]
    B, Le, D = enc_out.shape
    order = jnp.argsort(padding_label.astype(jnp.int32), axis=1, stable=True)   # valid-first
    valid_first = jnp.take_along_axis(enc_out, order[:, :, None], axis=1)       # [B, Le, D]
    rank = jnp.cumsum(encoder_labels.astype(jnp.int32), axis=1) - 1             # [B, Ld]
    rank = jnp.clip(rank, 0, Le - 1)
    src = jnp.take_along_axis(valid_first, rank[:, :, None], axis=1)            # [B, Ld, D]
    return jnp.where(encoder_labels[:, :, None], src.astype(dec_emb.dtype), dec_emb)


def scfoundation_forward(params, x, padding_label, encoder_position_gene_ids,
                         encoder_labels, decoder_data, decoder_position_gene_ids,
                         decoder_data_padding_labels):
    B, Le = x.shape
    Ld = decoder_data.shape[1]
    d_enc = params['pos_emb'].shape[1]

    # --- encoder path ---
    h = token_emb(x, params['token_emb'])                                   # [B,Le,d_enc] bf16
    h = h + jnp.take(params['pos_emb'], encoder_position_gene_ids, axis=0)  # pos emb gather
    h = transformer_layer(h, padding_label, params['encoder'])

    # --- decoder path ---
    d = token_emb(decoder_data, params['token_emb'])                        # [B,Ld,d_enc] bf16
    pos_d = jnp.take(params['pos_emb'], decoder_position_gene_ids, axis=0)
    d = scatter_encoder_outputs(d, h, padding_label, encoder_labels)
    d = d + pos_d
    d_dec = params['decoder_embed']['w'].shape[1]
    d = linear(d.reshape(B * Ld, d_enc), params['decoder_embed']['w'],
               params['decoder_embed']['b']).reshape(B, Ld, d_dec)
    d = transformer_layer(d, decoder_data_padding_labels, params['decoder'])
    # final LayerNorm + to_final (D->1) fused
    out = ln_to_final(d.reshape(B * Ld, d_dec), params['norm']['g'],
                      params['norm']['b'], params['to_final']['w'],
                      params['to_final']['b'])                              # [B*Ld, 1] f32
    return out.reshape(B, Ld)                                               # == squeeze(2)


# ----------------------------- parameter prep -----------------------------

def prepare_params(params):
    """One-time weight prep: fuse QKV, fold 1/sqrt(Dh) into Wq, cast matmul
    weights to bf16, pad token-emb bins to a lane-dense 128 multiple."""

    def prep_layer(p, d):
        H = p['heads']
        Dh = d // H
        scale = 1.0 / (Dh ** 0.5)
        wqkv = jnp.concatenate([p['wq'] * scale, p['wk'], p['wv']], axis=1)
        bqkv = jnp.concatenate([p['bq'] * scale, p['bk'], p['bv']], axis=0)
        F = p['w_ff1'].shape[1]
        return dict(
            heads=H,
            wqkv=wqkv.astype(jnp.bfloat16),
            bqkv=bqkv.reshape(1, 3 * d).astype(jnp.float32),
            wo=p['wo'].astype(jnp.bfloat16),
            bo=p['bo'].reshape(1, d).astype(jnp.float32),
            ln1_g=p['ln1_g'].reshape(1, d).astype(jnp.float32),
            ln1_b=p['ln1_b'].reshape(1, d).astype(jnp.float32),
            w_ff1=p['w_ff1'].astype(jnp.bfloat16),
            b_ff1=p['b_ff1'].reshape(1, F).astype(jnp.float32),
            w_ff2=p['w_ff2'].astype(jnp.bfloat16),
            b_ff2=p['b_ff2'].reshape(1, d).astype(jnp.float32),
            ln2_g=p['ln2_g'].reshape(1, d).astype(jnp.float32),
            ln2_b=p['ln2_b'].reshape(1, d).astype(jnp.float32),
        )

    te = params['token_emb']
    bins = te['w1'].shape[1]
    bins_p = _round_up(bins, 128)
    pb = bins_p - bins
    token = dict(
        w1=jnp.pad(te['w1'], ((0, 0), (0, pb))).astype(jnp.float32),
        b1=jnp.pad(te['b1'], ((0, 0), (0, pb))).astype(jnp.float32),
        w2=jnp.pad(te['w2'], ((0, pb), (0, pb))).astype(jnp.bfloat16),
        b2=jnp.pad(te['b2'], ((0, 0), (0, pb))).astype(jnp.float32),
        padbias=jnp.concatenate([jnp.zeros((1, bins), jnp.float32),
                                 jnp.full((1, pb), -1e9, jnp.float32)], axis=1),
        emb=jnp.pad(te['emb'], ((0, pb), (0, 0))).astype(jnp.bfloat16),
    )

    d_enc = params['pos_emb'].shape[1]
    d_dec = params['decoder_embed']['w'].shape[1]
    return dict(
        token_emb=token,
        pos_emb=params['pos_emb'].astype(jnp.bfloat16),
        encoder=prep_layer(params['encoder'], d_enc),
        decoder=prep_layer(params['decoder'], d_dec),
        decoder_embed=dict(
            w=params['decoder_embed']['w'].astype(jnp.bfloat16),
            b=params['decoder_embed']['b'].reshape(1, d_dec).astype(jnp.float32)),
        norm=dict(g=params['norm']['g'].reshape(1, d_dec).astype(jnp.float32),
                  b=params['norm']['b'].reshape(1, d_dec).astype(jnp.float32)),
        to_final=dict(w=params['to_final']['w'].reshape(1, d_dec).astype(jnp.float32),
                      b=params['to_final']['b'].reshape(1, 1).astype(jnp.float32)),
    )


# ----------------------------- parameter init -----------------------------

def _dense(key, fan_in, fan_out, scale=0.02):
    return scale * jax.random.normal(key, (fan_in, fan_out), jnp.float32)


def init_params(key, d_enc=32, d_dec=16, heads_enc=4, heads_dec=2,
                ff_enc=64, ff_dec=32, bins=16, n_genes=32):
    keys = iter(jax.random.split(key, 64))

    def nk():
        return next(keys)

    def layer(d, h, ff):
        return dict(
            heads=h,
            wq=_dense(nk(), d, d), bq=jnp.zeros((d,), jnp.float32),
            wk=_dense(nk(), d, d), bk=jnp.zeros((d,), jnp.float32),
            wv=_dense(nk(), d, d), bv=jnp.zeros((d,), jnp.float32),
            wo=_dense(nk(), d, d), bo=jnp.zeros((d,), jnp.float32),
            ln1_g=jnp.ones((d,), jnp.float32), ln1_b=jnp.zeros((d,), jnp.float32),
            w_ff1=_dense(nk(), d, ff), b_ff1=jnp.zeros((ff,), jnp.float32),
            w_ff2=_dense(nk(), ff, d), b_ff2=jnp.zeros((d,), jnp.float32),
            ln2_g=jnp.ones((d,), jnp.float32), ln2_b=jnp.zeros((d,), jnp.float32),
        )

    return dict(
        token_emb=dict(
            w1=_dense(nk(), 1, bins, 0.5), b1=jnp.zeros((1, bins), jnp.float32),
            w2=_dense(nk(), bins, bins, 0.5), b2=jnp.zeros((1, bins), jnp.float32),
            emb=_dense(nk(), bins, d_enc, 1.0),
        ),
        pos_emb=_dense(nk(), n_genes, d_enc, 0.1),   # nn.Embedding(n_genes, d_enc).weight
        encoder=layer(d_enc, heads_enc, ff_enc),
        decoder=layer(d_dec, heads_dec, ff_dec),
        decoder_embed=dict(w=_dense(nk(), d_enc, d_dec),
                           b=jnp.zeros((d_dec,), jnp.float32)),
        norm=dict(g=jnp.ones((d_dec,), jnp.float32),
                  b=jnp.zeros((d_dec,), jnp.float32)),
        to_final=dict(w=_dense(nk(), d_dec, 1), b=jnp.zeros((1,), jnp.float32)),
    )


# ----------------------------- main -----------------------------

if __name__ == "__main__":
    key = jax.random.PRNGKey(0)
    kp, kx, kd, kg1, kg2 = jax.random.split(key, 5)

    B, Le, Ld = 2, 8, 12
    n_genes = 32
    raw_params = init_params(kp, n_genes=n_genes)
    params = prepare_params(raw_params)   # fuse / scale / bf16-cast weights once

    x = jax.random.uniform(kx, (B, Le), jnp.float32, 0.0, 5.0)
    decoder_data = jax.random.uniform(kd, (B, Ld), jnp.float32, 0.0, 5.0)
    encoder_position_gene_ids = jax.random.randint(kg1, (B, Le), 0, n_genes)
    decoder_position_gene_ids = jax.random.randint(kg2, (B, Ld), 0, n_genes)

    # padding_label: True = padded encoder token (row0: 0 pads, row1: 2 pads).
    padding_label = jnp.array(
        [[False] * 8,
         [False] * 6 + [True] * 2], dtype=bool)
    # encoder_labels: decoder positions holding encoder tokens; per-row True
    # count equals the per-row count of non-padded encoder tokens (8 and 6).
    encoder_labels = jnp.array(
        [[True] * 8 + [False] * 4,
         [True, False, True, False, True, False, True, False, True, False, True, False]],
        dtype=bool)
    decoder_data_padding_labels = jnp.array(
        [[False] * 11 + [True],
         [False] * 10 + [True, True]], dtype=bool)

    out = scfoundation_forward(params, x, padding_label, encoder_position_gene_ids,
                               encoder_labels, decoder_data, decoder_position_gene_ids,
                               decoder_data_padding_labels)
    out = jax.block_until_ready(out)
    assert out.shape == (B, Ld) and out.dtype == jnp.float32
    print("KERNEL_OK")
</pallas_src>

<mosaic_0001>
module attributes {stable_mosaic.version = 11 : i64} {
  func.func @_probe_kernel(%arg0: i32, %arg1: memref<8x128xf32, #tpu.memory_space<vmem>>, %arg2: memref<8x128xf32, #tpu.memory_space<vmem>>) attributes {dimension_semantics = [#tpu.dimension_semantics<arbitrary>], iteration_bounds = array<i64: 1>, scalar_prefetch = 0 : i64, scratch_operands = 0 : i64, tpu.core_type = #tpu.core_type<tc>, window_params = [{pipeline_mode = #tpu.pipeline_mode<synchronous>, transform_indices = @transform_0, window_bounds = array<i64: 8, 128>}, {pipeline_mode = #tpu.pipeline_mode<synchronous>, transform_indices = @transform_1, window_bounds = array<i64: 8, 128>}]} {
    %c0 = arith.constant 0 : index
    %c0_0 = arith.constant 0 : index
    %0 = vector.load %arg1[%c0, %c0_0] : memref<8x128xf32, #tpu.memory_space<vmem>>, vector<8x128xf32>
    %cst = arith.constant 2.000000e+00 : f32
    %1 = vector.broadcast %cst : f32 to vector<8x128xf32>
    %2 = arith.mulf %0, %1 : vector<8x128xf32>
    %c0_1 = arith.constant 0 : index
    %c0_2 = arith.constant 0 : index
    %3 = vector.load %arg2[%c0_1, %c0_2] : memref<8x128xf32, #tpu.memory_space<vmem>>, vector<8x128xf32>
    tpu.vector_store %arg2[%c0_1, %c0_2], %2 {strides = array<i32>} : memref<8x128xf32, #tpu.memory_space<vmem>>, vector<8x128xf32>,
    return
  }
  func.func @transform_0(%arg0: i32) -> (i32, i32) {
    %c0_i32 = arith.constant 0 : i32
    %c0_i32_0 = arith.constant 0 : i32
    %c0_i32_1 = arith.constant 0 : i32
    return %c0_i32, %c0_i32_0 : i32, i32
  }
  func.func @transform_1(%arg0: i32) -> (i32, i32) {
    %c0_i32 = arith.constant 0 : i32
    %c0_i32_0 = arith.constant 0 : i32
    %c0_i32_1 = arith.constant 0 : i32
    return %c0_i32, %c0_i32_0 : i32, i32
  }
}

module attributes {stable_mosaic.version = 11 : i64} {
  func.func @_token_emb_kernel(%arg0: i32, %arg1: memref<8x1xf32, #tpu.memory_space<vmem>>, %arg2: memref<1x128xf32, #tpu.memory_space<vmem>>, %arg3: memref<1x128xf32, #tpu.memory_space<vmem>>, %arg4: memref<128x128xbf16, #tpu.memory_space<vmem>>, %arg5: memref<1x128xf32, #tpu.memory_space<vmem>>, %arg6: memref<1x128xf32, #tpu.memory_space<vmem>>, %arg7: memref<128x32xbf16, #tpu.memory_space<vmem>>, %arg8: memref<8x32xbf16, #tpu.memory_space<vmem>>) attributes {dimension_semantics = [#tpu.dimension_semantics<parallel>], iteration_bounds = array<i64: 2>, scalar_prefetch = 0 : i64, scratch_operands = 0 : i64, tpu.core_type = #tpu.core_type<tc>, window_params = [{transform_indices = @transform_0, window_bounds = array<i64: 8, 1>}, {pipeline_mode = #tpu.pipeline_mode<synchronous>, transform_indices = @transform_1, window_bounds = array<i64: 1, 128>}, {pipeline_mode = #tpu.pipeline_mode<synchronous>, transform_indices = @transform_2, window_bounds = array<i64: 1, 128>}, {pipeline_mode = #tpu.pipeline_mode<synchronous>, transform_indices = @transform_3, window_bounds = array<i64: 128, 128>}, {pipeline_mode = #tpu.pipeline_mode<synchronous>, transform_indices = @transform_4, window_bounds = array<i64: 1, 128>}, {pipeline_mode = #tpu.pipeline_mode<synchronous>, transform_indices = @transform_5, window_bounds = array<i64: 1, 128>}, {pipeline_mode = #tpu.pipeline_mode<synchronous>, transform_indices = @transform_6, window_bounds = array<i64: 128, 32>}, {transform_indices = @transform_7, window_bounds = array<i64: 8, 32>}]} {
    %c0 = arith.constant 0 : index
    %c0_0 = arith.constant 0 : index
    %0 = vector.load %arg1[%c0, %c0_0] : memref<8x1xf32, #tpu.memory_space<vmem>>, vector<8x1xf32>
    %c0_1 = arith.constant 0 : index
    %c0_2 = arith.constant 0 : index
    %1 = vector.load %arg2[%c0_1, %c0_2] : memref<1x128xf32, #tpu.memory_space<vmem>>, vector<1x128xf32>
    %2 = vector.broadcast %0 : vector<8x1xf32> to vector<8x128xf32>
    %3 = vector.broadcast %1 : vector<1x128xf32> to vector<8x128xf32>
    %4 = arith.mulf %2, %3 : vector<8x128xf32>
    %c0_3 = arith.constant 0 : index
    %c0_4 = arith.constant 0 : index
    %5 = vector.load %arg3[%c0_3, %c0_4] : memref<1x128xf32, #tpu.memory_space<vmem>>, vector<1x128xf32>
    %6 = vector.broadcast %5 : vector<1x128xf32> to vector<8x128xf32>
    %7 = arith.addf %4, %6 : vector<8x128xf32>
    %cst = arith.constant 0.000000e+00 : f32
    %8 = vector.broadcast %cst : f32 to vector<8x128xf32>
    %9 = arith.cmpf ogt, %7, %8 : vector<8x128xf32>
    %cst_5 = arith.constant 1.000000e-01 : f32
    %10 = vector.broadcast %cst_5 : f32 to vector<8x128xf32>
    %11 = arith.mulf %10, %7 : vector<8x128xf32>
    %12 = arith.select %9, %7, %11 : vector<8x128xi1>, vector<8x128xf32>
    %13 = arith.truncf %12 : vector<8x128xf32> to vector<8x128xbf16>
    %c0_6 = arith.constant 0 : index
    %c0_7 = arith.constant 0 : index
    %14 = vector.load %arg4[%c0_6, %c0_7] : memref<128x128xbf16, #tpu.memory_space<vmem>>, vector<128x128xbf16>
    %cst_8 = arith.constant dense<0.000000e+00> : vector<8x128xf32>
    %15 = tpu.matmul %13, %14, %cst_8 {dimension_numbers = #tpu.dot_dimension_numbers<[1], [0], [0], [1], [0, 0, 1, 1], [], []>} : vector<8x128xbf16>, vector<128x128xbf16>, vector<8x128xf32> -> vector<8x128xf32>
    %c0_9 = arith.constant 0 : index
    %c0_10 = arith.constant 0 : index
    %16 = vector.load %arg5[%c0_9, %c0_10] : memref<1x128xf32, #tpu.memory_space<vmem>>, vector<1x128xf32>
    %17 = vector.broadcast %16 : vector<1x128xf32> to vector<8x128xf32>
    %18 = arith.addf %15, %17 : vector<8x128xf32>
    %cst_11 = arith.constant 1.000000e+00 : f32
    %19 = vector.broadcast %cst_11 : f32 to vector<8x128xf32>
    %20 = arith.mulf %19, %12 : vector<8x128xf32>
    %21 = arith.addf %20, %18 : vector<8x128xf32>
    %c0_12 = arith.constant 0 : index
    %c0_13 = arith.constant 0 : index
    %22 = vector.load %arg6[%c0_12, %c0_13] : memref<1x128xf32, #tpu.memory_space<vmem>>, vector<1x128xf32>
    %23 = vector.broadcast %22 : vector<1x128xf32> to vector<8x128xf32>
    %24 = arith.addf %21, %23 : vector<8x128xf32>
    %cst_14 = arith.constant dense<0xFF800000> : vector<8xf32>
    %25 = vector.multi_reduction <maximumf>, %24, %cst_14 [1] : vector<8x128xf32> to vector<8xf32>
    %26 = vector.shape_cast %25 : vector<8xf32> to vector<8x1xf32>
    %27 = vector.broadcast %26 : vector<8x1xf32> to vector<8x128xf32>
    %28 = arith.subf %24, %27 : vector<8x128xf32>
    %29 = math.exp %28 : vector<8x128xf32>
    %cst_15 = arith.constant dense<0.000000e+00> : vector<8xf32>
    %30 = vector.multi_reduction <add>, %29, %cst_15 [1] : vector<8x128xf32> to vector<8xf32>
    %31 = vector.shape_cast %30 : vector<8xf32> to vector<8x1xf32>
    %32 = vector.broadcast %31 : vector<8x1xf32> to vector<8x128xf32>
    %33 = arith.divf %29, %32 : vector<8x128xf32>
    %34 = arith.truncf %33 : vector<8x128xf32> to vector<8x128xbf16>
    %c0_16 = arith.constant 0 : index
    %c0_17 = arith.constant 0 : index
    %35 = vector.load %arg7[%c0_16, %c0_17] : memref<128x32xbf16, #tpu.memory_space<vmem>>, vector<128x32xbf16>
    %cst_18 = arith.constant dense<0.000000e+00> : vector<8x32xf32>
    %36 = tpu.matmul %34, %35, %cst_18 {dimension_numbers = #tpu.dot_dimension_numbers<[1], [0], [0], [1], [0, 0, 1, 1], [], []>} : vector<8x128xbf16>, vector<128x32xbf16>, vector<8x32xf32> -> vector<8x32xf32>
    %37 = arith.truncf %36 : vector<8x32xf32> to vector<8x32xbf16>
    %c0_19 = arith.constant 0 : index
    %c0_20 = arith.constant 0 : index
    %38 = vector.load %arg8[%c0_19, %c0_20] : memref<8x32xbf16, #tpu.memory_space<vmem>>, vector<8x32xbf16>
    tpu.vector_store %arg8[%c0_19, %c0_20], %37 {strides = array<i32>} : memref<8x32xbf16, #tpu.memory_space<vmem>>, vector<8x32xbf16>,
    return
  }
  func.func @transform_0(%arg0: i32) -> (i32, i32) {
    %c0_i32 = arith.constant 0 : i32
    %c0_i32_0 = arith.constant 0 : i32
    return %arg0, %c0_i32 : i32, i32
  }
  func.func @transform_1(%arg0: i32) -> (i32, i32) {
    %c0_i32 = arith.constant 0 : i32
    %c0_i32_0 = arith.constant 0 : i32
    %c0_i32_1 = arith.constant 0 : i32
    return %c0_i32, %c0_i32_0 : i32, i32
  }
  func.func @transform_2(%arg0: i32) -> (i32, i32) {
    %c0_i32 = arith.constant 0 : i32
    %c0_i32_0 = arith.constant 0 : i32
    %c0_i32_1 = arith.constant 0 : i32
    return %c0_i32, %c0_i32_0 : i32, i32
  }
  func.func @transform_3(%arg0: i32) -> (i32, i32) {
    %c0_i32 = arith.constant 0 : i32
    %c0_i32_0 = arith.constant 0 : i32
    %c0_i32_1 = arith.constant 0 : i32
    return %c0_i32, %c0_i32_0 : i32, i32
  }
  func.func @transform_4(%arg0: i32) -> (i32, i32) {
    %c0_i32 = arith.constant 0 : i32
    %c0_i32_0 = arith.constant 0 : i32
    %c0_i32_1 = arith.constant 0 : i32
    return %c0_i32, %c0_i32_0 : i32, i32
  }
  func.func @transform_5(%arg0: i32) -> (i32, i32) {
    %c0_i32 = arith.constant 0 : i32
    %c0_i32_0 = arith.constant 0 : i32
    %c0_i32_1 = arith.constant 0 : i32
    return %c0_i32, %c0_i32_0 : i32, i32
  }
  func.func @transform_6(%arg0: i32) -> (i32, i32) {
    %c0_i32 = arith.constant 0 : i32
    %c0_i32_0 = arith.constant 0 : i32
    %c0_i32_1 = arith.constant 0 : i32
    return %c0_i32, %c0_i32_0 : i32, i32
  }
  func.func @transform_7(%arg0: i32) -> (i32, i32) {
    %c0_i32 = arith.constant 0 : i32
    %c0_i32_0 = arith.constant 0 : i32
    return %arg0, %c0_i32 : i32, i32
  }
}

</mosaic_0001>

<bundles_post_ra>
// kernel: tpu_custom_call.1
= control target key start
LH: loop header
LB: loop body
LE: loop exit
PB: predicated region body
PF: predicated region fallthrough
CT: control target
= control target key end

     0   :  { %6 = vsyncpa [#allocation3], 0  ;;  %s125_s0 = inlined_call_operand.hbm [shape: f32[8,128], index: 0, kind: input, shape index: {}]   ;;  %s126_s1 = inlined_call_operand.hbm [shape: f32[8,128], index: 1, kind: output, shape index: {}]  }
   0x1   :  { %7 = vsyncpa [#allocation4], 0  ;;  %s89_s6 = smov [#allocation2]   ;;  %s41_s10 = scalar_lea.hbm %s125_s0, 128 }
   0x2   :  { %s14_s7 = sshll.u32 %s89_s6, 4  ;;  %p42_p0 = scmp.ne.s32.totalorder %s125_s0, %s41_s10  ;;  %s15_s7 = int_to_ptr.vmem [resolvable:$true] %s14_s7 }
   0x3   :  { %p45_p1 = scmp.lt.u32.totalorder %s41_s10, %s125_s0 }
   0x5   :  { %p47_p2 = pnand %p45_p1, %p42_p0 }
   0x7   :  { %50 = shalt.err (!%p47_p2)
}
   0x8   :  { %s51_s15 = scalar_lea.vmem %s15_s7, 128  ;;  %p56_p4 = scmp.lt.s32.totalorder %s15_s7, %s15_s7 }
   0x9   :  { %p52_p3 = scmp.ne.s32.totalorder %s15_s7, %s51_s15  ;;  %p57_p5 = scmp.lt.s32.totalorder %s51_s15, %s51_s15 }
   0xb   :  { %p58_p6 = por %p57_p5, %p56_p4 }
   0xd   :  { %p59_p7 = pnand %p58_p6, %p52_p3 }
   0xf   :  { %62 = shalt.err (!%p59_p7)
}
  0x10   :  { %17 = dma.hbm_to_vmem [thread:$0]  %s125_s0, 128, %s15_s7, [#allocation3]  }
  0x11   :  { %85 = dma.done.wait [#allocation3], 128  }
  0x12   :  { %86 = vsyncadd [#allocation3], 4294967168  ;;  %s90_s18 = smov [#allocation5]   ;;  %v21_v0 = vld [vmem:[#allocation2] sm:$0xff] }
  0x13   :  { %s30_s19 = sshll.u32 %s90_s18, 4  ;;  %v22_v1 = vmul.f32 2.0, %v21_v0  ;;  %s31_s19 = int_to_ptr.vmem [resolvable:$true] %s30_s19 }
  0x14   :  { %s63_s20 = scalar_lea.vmem %s31_s19, 128  ;;  %p68_p9 = scmp.lt.s32.totalorder %s31_s19, %s31_s19 }
  0x15   :  { %23 = vst [vmem:[#allocation5] sm:$0xff] %v22_v1  ;;  %p64_p8 = scmp.ne.s32.totalorder %s31_s19, %s63_s20  ;;  %p69_p10 = scmp.lt.s32.totalorder %s63_s20, %s63_s20 }
  0x17   :  { %p70_p11 = por %p69_p10, %p68_p9 }
  0x19   :  { %p71_p12 = pnand %p70_p11, %p64_p8 }
  0x1b   :  { %74 = shalt.err (!%p71_p12)
}
  0x1c   :  { %s75_s23 = scalar_lea.hbm %s126_s1, 128 }
  0x1d   :  { %p76_p13 = scmp.ne.s32.totalorder %s126_s1, %s75_s23  ;;  %p79_p0 = scmp.lt.u32.totalorder %s75_s23, %s126_s1 }
  0x1f   :  { %p81_p1 = pnand %p79_p0, %p76_p13 }
  0x21   :  { %84 = shalt.err (!%p81_p1)
}
  0x22   :  { %33 = dma.vmem_to_hbm [thread:$0]  %s31_s19, 128, %s126_s1, [#allocation4]  }
  0x23   :  { %87 = dma.done.wait [#allocation4], 128  }
  0x24   :  { %88 = vsyncadd [#allocation4], 4294967168 }
  0x25   :  { %37 = vsyncpa [#allocation3], 1 }
  0x26   :  { %38 = vsyncpa [#allocation4], 1 }

// kernel: tpu_custom_call.1
= control target key start
LH: loop header
LB: loop body
LE: loop exit
PB: predicated region body
PF: predicated region fallthrough
CT: control target
= control target key end

     0   :  { %12 = vsyncpa [#allocation3], 0  ;;  %s1691_s0 = inlined_call_operand.hbm [shape: f32[16,1], index: 0, kind: input, shape index: {}]   ;;  %s1692_s1 = inlined_call_operand.hbm [shape: f32[1,128], index: 1, kind: input, shape index: {}]   ;;  %s1693_s2 = inlined_call_operand.hbm [shape: f32[1,128], index: 2, kind: input, shape index: {}]   ;;  %s1694_s3 = inlined_call_operand.hbm [shape: bf16[128,128], index: 3, kind: input, shape index: {}]   ;;  %s1695_s4 = inlined_call_operand.hbm [shape: f32[1,128], index: 4, kind: input, shape index: {}]   ;;  %s1696_s5 = inlined_call_operand.hbm [shape: f32[1,128], index: 5, kind: input, shape index: {}]   ;;  %s1697_s6 = inlined_call_operand.hbm [shape: bf16[128,32], index: 6, kind: input, shape index: {}]   ;;  %s1698_s7 = inlined_call_operand.hbm [shape: bf16[16,32], index: 7, kind: output, shape index: {}]  }
   0x1   :  { %14 = vsyncpa [#allocation3 + $0x1], 0 }
   0x2   :  { %15 = vsyncpa [#allocation6], 0 }
   0x3   :  { %16 = vsyncpa [#allocation9], 0 }
   0x4   :  { %17 = vsyncpa [#allocation12], 0 }
   0x5   :  { %18 = vsyncpa [#allocation4], 0 }
   0x6   :  { %20 = vsyncpa [#allocation4 + $0x1], 0  ;;  %s1344_s24 = smov 0   ;;  %s1346_s25 = smov 0  }
   0x7   :  { %s1348_s26 = smov 0   ;;  %s1350_s27 = smov 0  }
   0x8 LB: > { %s1291_s28 = smov [#allocation5]   ;;  %s1365_s30 = sadd.s32 4294967295, %s1289_s27   ;;  %s1289_s27 = sphi %s1350_s27, %s1724_s27   ;;  %s1285_s26 = sphi %s1348_s26, %s1723_s26   ;;  %s1281_s25 = sphi %s1346_s25, %s1722_s25   ;;  %s1277_s24 = sphi %s1344_s24, %s1721_s24  }
   0x9   : > { %s222_s29 = sshll.u32 %s1291_s28, 4  ;;  %p779_p0 = scmp.ge.s32.totalorder %s1289_s27, 1  ;;  %s1370_s29 = int_to_ptr.vmem [resolvable:$true] %s222_s29 }
   0xa   : > { %p1699_p1 = scmp.eq.s32.totalorder %s1365_s30, 0  ;;  %p209_p2 = scmp.lt.s32.totalorder %s1289_s27, 3 }
   0xb   : > { %s1292_s9 = smov [#allocation8]   ;;  %s1293_s12 = smov [#allocation11]  }
   0xc   : > { %p1372_p3 = pnand %p779_p0, %p209_p2  ;;  %s243_s10 = sshll.u32 %s1292_s9, 4  ;;  %s1379_s10 = int_to_ptr.vmem [resolvable:$true] %s243_s10 }
   0xd   : > { %s268_s13 = sshll.u32 %s1293_s12, 4  ;;  %s1013_s16 = scalar_lea.hbm %s1692_s1, 16  ;;  %s1387_s13 = int_to_ptr.vmem [resolvable:$true] %s268_s13 }
   0xe   : > { %s1702_s8 = scalar_select %p1372_p3, 1, 0 }
   0xf   : > { %p908_p5 = pneg %p1372_p3  ;;  %p1014_p7 = scmp.ne.s32.totalorder %s1692_s1, %s1013_s16 }
  0x10   : > { %p1020_p11 = scmp.lt.u32.totalorder %s1013_s16, %s1692_s1 }
  0x11   : > { %p1383_p6 = pnand %p908_p5, %p1699_p1 }
  0x13   : > { %p1397_p8 = pneg %p1383_p6 }
  0x15   : > { %p1016_p9 = pnand %p1397_p8, %p1014_p7 }
  0x17   : > { %p1017_p10 = pneg %p1016_p9 }
  0x19   : > { %p1022_p12 = pnand %p1020_p11, %p1017_p10 }
  0x1b   : > { %1025 = shalt.err (!%p1022_p12)
}
  0x1c   : > { %s1026_s22 = scalar_lea.vmem %s1370_s29, 16  ;;  %s1033_s23 = scalar_lea.vmem %s1370_s29, 32 }
  0x1d   : > { %p1027_p13 = scmp.ne.s32.totalorder %s1370_s29, %s1026_s22  ;;  %p1034_p5 = scmp.lt.s32.totalorder %s1370_s29, %s1370_s29 }
  0x1e   : > { %p1035_p7 = scmp.lt.s32.totalorder %s1033_s23, %s1026_s22 }
  0x1f   : > { %p1029_p0 = pnand %p1027_p13, %p1397_p8 }
  0x20   : > { %p1036_p9 = por %p1035_p7, %p1034_p5 }
  0x21   : > { %p1030_p2 = pneg %p1029_p0 }
  0x23   : > { %p1037_p4 = pnand %p1036_p9, %p1030_p2 }
  0x25   : > { %1040 = shalt.err (!%p1037_p4)
}
  0x26   : > { %911 = dma.hbm_to_vmem [thread:$0]  (!%p1383_p6), %s1692_s1, 16, %s1370_s29, [#allocation6]  }
  0x27   : > { %s1041_s15 = scalar_lea.hbm %s1694_s3, 1024 }
  0x28   : > { %p1042_p10 = scmp.ne.s32.totalorder %s1694_s3, %s1041_s15  ;;  %p1048_p4 = scmp.lt.u32.totalorder %s1041_s15, %s1694_s3 }
  0x2a   : > { %p1044_p11 = pnand %p1042_p10, %p1397_p8 }
  0x2c   : > { %p1045_p12 = pneg %p1044_p11 }
  0x2e   : > { %p1050_p13 = pnand %p1048_p4, %p1045_p12 }
  0x30   : > { %1053 = shalt.err (!%p1050_p13)
}
  0x31   : > { %s1054_s29 = scalar_lea.vmem %s1379_s10, 1024  ;;  %p1062_p7 = scmp.lt.s32.totalorder %s1379_s10, %s1379_s10 }
  0x32   : > { %p1055_p0 = scmp.ne.s32.totalorder %s1379_s10, %s1054_s29  ;;  %p1063_p9 = scmp.lt.s32.totalorder %s1054_s29, %s1054_s29 }
  0x34   : > { %p1057_p2 = pnand %p1055_p0, %p1397_p8  ;;  %p1064_p10 = por %p1063_p9, %p1062_p7 }
  0x36   : > { %p1058_p5 = pneg %p1057_p2 }
  0x38   : > { %p1065_p11 = pnand %p1064_p10, %p1058_p5 }
  0x3a   : > { %1068 = shalt.err (!%p1065_p11)
}
  0x3b   : > { %s1294_s21 = smov 64   ;;  %s1295_s22 = smov 4  }
  0x3c   : > { %917 = dma.hbm_to_vmem [thread:$0]  (!%p1383_p6), %s1694_s3, 1024, %s1379_s10, [#allocation9], %s1294_s21, %s1294_s21, %s1295_s22  }
  0x3d   : > { %s1069_s14 = scalar_lea.hbm %s1696_s5, 16 }
  0x3e   : > { %p1070_p12 = scmp.ne.s32.totalorder %s1696_s5, %s1069_s14  ;;  %p1076_p0 = scmp.lt.u32.totalorder %s1069_s14, %s1696_s5 }
  0x40   : > { %p1072_p4 = pnand %p1070_p12, %p1397_p8 }
  0x42   : > { %p1073_p13 = pneg %p1072_p4 }
  0x44   : > { %p1078_p2 = pnand %p1076_p0, %p1073_p13 }
  0x46   : > { %1081 = shalt.err (!%p1078_p2)
}
  0x47   : > { %s1082_s10 = scalar_lea.vmem %s1387_s13, 16  ;;  %s1089_s20 = scalar_lea.vmem %s1387_s13, 32 }
  0x48   : > { %p1083_p5 = scmp.ne.s32.totalorder %s1387_s13, %s1082_s10  ;;  %p1090_p10 = scmp.lt.s32.totalorder %s1387_s13, %s1387_s13 }
  0x49   : > { %p1091_p11 = scmp.lt.s32.totalorder %s1089_s20, %s1082_s10 }
  0x4a   : > { %p1085_p7 = pnand %p1083_p5, %p1397_p8 }
  0x4b   : > { %p1092_p12 = por %p1091_p11, %p1090_p10 }
  0x4c   : > { %p1086_p9 = pneg %p1085_p7 }
  0x4e   : > { %p1093_p4 = pnand %p1092_p12, %p1086_p9 }
  0x50   : > { %1096 = shalt.err (!%p1093_p4)
}
  0x51   : > { %923 = dma.hbm_to_vmem [thread:$0]  (!%p1383_p6), %s1696_s5, 16, %s1387_s13, [#allocation12]  }
  0x52   : > { %s1296_s28 = smov [#allocation7]   ;;  %s1297_s12 = smov [#allocation10]  }
  0x53   : > { %s233_s9 = sshll.u32 %s1296_s28, 4  ;;  %s257_s14 = sshll.u32 %s1297_s12, 4  ;;  %s234_s9 = int_to_ptr.vmem [resolvable:$true] %s233_s9  ;;  %s258_s14 = int_to_ptr.vmem [resolvable:$true] %s257_s14 }
  0x54   : > { %s1097_s17 = scalar_lea.hbm %s1693_s2, 16 }
  0x55   : > { %p1098_p13 = scmp.ne.s32.totalorder %s1693_s2, %s1097_s17  ;;  %p1104_p5 = scmp.lt.u32.totalorder %s1097_s17, %s1693_s2 }
  0x57   : > { %p1100_p0 = pnand %p1098_p13, %p1397_p8 }
  0x59   : > { %p1101_p2 = pneg %p1100_p0 }
  0x5b   : > { %p1106_p7 = pnand %p1104_p5, %p1101_p2 }
  0x5d   : > { %1109 = shalt.err (!%p1106_p7)
}
  0x5e   : > { %s1110_s13 = scalar_lea.vmem %s234_s9, 16  ;;  %s1117_s23 = scalar_lea.vmem %s234_s9, 32 }
  0x5f   : > { %p1111_p9 = scmp.ne.s32.totalorder %s234_s9, %s1110_s13  ;;  %p1118_p12 = scmp.lt.s32.totalorder %s234_s9, %s234_s9 }
  0x60   : > { %p1119_p4 = scmp.lt.s32.totalorder %s1117_s23, %s1110_s13 }
  0x61   : > { %p1113_p10 = pnand %p1111_p9, %p1397_p8 }
  0x62   : > { %p1120_p1 = por %p1119_p4, %p1118_p12 }
  0x63   : > { %p1114_p11 = pneg %p1113_p10 }
  0x65   : > { %p1121_p3 = pnand %p1120_p1, %p1114_p11 }
  0x67   : > { %1124 = shalt.err (!%p1121_p3)
}
  0x68   : > { %914 = dma.hbm_to_vmem [thread:$0]  (!%p1383_p6), %s1693_s2, 16, %s234_s9, [#allocation6]  }
  0x69   : > { %s1125_s17 = scalar_lea.hbm %s1695_s4, 16 }
  0x6a   : > { %p1126_p13 = scmp.ne.s32.totalorder %s1695_s4, %s1125_s17  ;;  %p1132_p3 = scmp.lt.u32.totalorder %s1125_s17, %s1695_s4 }
  0x6c   : > { %p1128_p0 = pnand %p1126_p13, %p1397_p8 }
  0x6e   : > { %p1129_p1 = pneg %p1128_p0 }
  0x70   : > { %p1134_p2 = pnand %p1132_p3, %p1129_p1 }
  0x72   : > { %1137 = shalt.err (!%p1134_p2)
}
  0x73   : > { %s1138_s13 = scalar_lea.vmem %s258_s14, 16  ;;  %s1145_s9 = scalar_lea.vmem %s258_s14, 32 }
  0x74   : > { %p1139_p5 = scmp.ne.s32.totalorder %s258_s14, %s1138_s13  ;;  %p1146_p10 = scmp.lt.s32.totalorder %s258_s14, %s258_s14 }
  0x75   : > { %p1147_p11 = scmp.lt.s32.totalorder %s1145_s9, %s1138_s13 }
  0x76   : > { %p1141_p7 = pnand %p1139_p5, %p1397_p8 }
  0x77   : > { %p1148_p12 = por %p1147_p11, %p1146_p10 }
  0x78   : > { %p1142_p9 = pneg %p1141_p7 }
  0x7a   : > { %p1149_p4 = pnand %p1148_p12, %p1142_p9 }
  0x7c   : > { %1152 = shalt.err (!%p1149_p4)
}
  0x7d   : > { %920 = dma.hbm_to_vmem [thread:$0]  (!%p1383_p6), %s1695_s4, 16, %s258_s14, [#allocation9]  }
  0x7e   : > { %s1298_s12 = smov [#allocation13]   ;;  %s1153_s18 = scalar_lea.hbm %s1697_s6, 1024 }
  0x7f   : > { %s278_s15 = sshll.u32 %s1298_s12, 4  ;;  %p1154_p13 = scmp.ne.s32.totalorder %s1697_s6, %s1153_s18  ;;  %s279_s15 = int_to_ptr.vmem [resolvable:$true] %s278_s15 }
  0x80   : > { %p1160_p3 = scmp.lt.u32.totalorder %s1153_s18, %s1697_s6 }
  0x81   : > { %p1156_p0 = pnand %p1154_p13, %p1397_p8 }
  0x83   : > { %p1157_p1 = pneg %p1156_p0 }
  0x85   : > { %p1162_p2 = pnand %p1160_p3, %p1157_p1 }
  0x87   : > { %1165 = shalt.err (!%p1162_p2)
}
  0x88   : > { %s1166_s14 = scalar_lea.vmem %s279_s15, 1024  ;;  %p1174_p10 = scmp.lt.s32.totalorder %s279_s15, %s279_s15 }
  0x89   : > { %p1167_p5 = scmp.ne.s32.totalorder %s279_s15, %s1166_s14  ;;  %p1175_p11 = scmp.lt.s32.totalorder %s1166_s14, %s1166_s14 }
  0x8b   : > { %p1169_p7 = pnand %p1167_p5, %p1397_p8  ;;  %p1176_p12 = por %p1175_p11, %p1174_p10 }
  0x8d   : > { %p1170_p9 = pneg %p1169_p7 }
  0x8f   : > { %p1177_p4 = pnand %p1176_p12, %p1170_p9 }
  0x91   : > { %1180 = shalt.err (!%p1177_p4)
}
  0x92   : > { %926 = dma.hbm_to_vmem [thread:$0]  (!%p1383_p6), %s1697_s6, 1024, %s279_s15, [#allocation12], %s1294_s21, %s1294_s21, %s1295_s22  }
  0x93   : > { %s778_s11 = sadd.s32 4294967294, %s1289_s27   ;;  %s1528_s19 = sadd.s32 1, %s1289_s27  }
  0x94   : > { %s30_s28 = ssub.s32 %s1289_s27, %s1528_s19  ;;  %s33_s12 = sadd.s32 1, %s1285_s26 }
  0x95   : > { %p31_p8 = scmp.eq.s32.totalorder %s30_s28, 0  ;;  %p40_p13 = scmp.ne.s32.totalorder %s1285_s26, %s1281_s25 }
  0x96   : > { %p41_p0 = scmp.eq.s32.totalorder %s1289_s27, 0  ;;  %p46_p1 = scmp.ne.s32.totalorder %s1281_s25, %s1277_s24 }
  0x97   : > { %s1539_s16 = scalar_select %p31_p8, %s1285_s26, %s33_s12  }
  0x98   : > { %p1541_p3 = por %p41_p0, %p40_p13  ;;  %p1706_p2 = scmp.eq.s32.totalorder %s1365_s30, 0 }
  0x99   : > { %p196_p5 = scmp.eq.s32.totalorder %s1365_s30, 1  ;;  %p202_p7 = scmp.eq.s32.totalorder %s778_s11, 1 }
  0x9a   : > { %p1547_p6 = por %p1706_p2, %p46_p1  ;;  %p941_p9 = scmp.lt.s32.totalorder %s1289_s27, 2 }
  0x9b   : > { %s292_s22 = sand.u32 1, %s1285_s26   ;;  %p1554_p10 = por %p196_p5, %p40_p13 }
  0x9c   : > { %p1558_p11 = por %p202_p7, %p46_p1  ;;  %s787_s10 = sshll.u32 %s292_s22, 3 }
  0x9d   : > { %s1708_s15 = scalar_select %p1554_p10, 1, 0 }
  0x9e   : > { %s1709_s18 = scalar_select %p1558_p11, 1, 0 }
  0x9f   : > { %s788_s20 = sshll.u32 %s1289_s27, 7  ;;  %s296_s9 = scalar_lea.vmem [#allocation2], %s787_s10 }
  0xa0   : > { %s1566_s14 = scalar_lea.hbm %s1691_s0, %s788_s20  ;;  %s303_s23 = sshll.u32 %s296_s9, 4  ;;  %s1568_s23 = int_to_ptr.vmem [resolvable:$true] %s303_s23 }
  0xa1   : > { %p1572_p12 = pnand %p941_p9, %p1541_p3  ;;  %s293_s28 = scalar_lea.sflag [#allocation3], %s292_s22 }
  0xa2   : > { %s1181_s12 = scalar_lea.hbm %s1566_s14, 128  ;;  %s1186_s29 = scalar_lea.hbm %s1691_s0, 256 }
  0xa3   : > { %p1182_p4 = scmp.ne.s32.totalorder %s1566_s14, %s1181_s12  ;;  %p1183_p8 = pneg %p1572_p12 }
  0xa4   : > { %p1187_p1 = scmp.lt.u32.totalorder %s1566_s14, %s1691_s0  ;;  %p1188_p3 = scmp.lt.u32.totalorder %s1186_s29, %s1181_s12 }
  0xa5   : > { %p1184_p13 = pnand %p1183_p8, %p1182_p4  ;;  %p1190_p5 = scmp.lt.u32.totalorder %s1181_s12, %s1566_s14 }
  0xa6   : > { %p1189_p2 = por %p1188_p3, %p1187_p1 }
  0xa7   : > { %p1185_p0 = pneg %p1184_p13 }
  0xa8   : > { %p1191_p7 = por %p1190_p5, %p1189_p2 }
  0xaa   : > { %p1192_p9 = pnand %p1191_p7, %p1185_p0 }
  0xac   : > { %1195 = shalt.err (!%p1192_p9)
}
  0xad   : > { %s1196_s22 = scalar_lea.vmem %s1568_s23, 128  ;;  %s1299_s9 = smov [#allocation2]  }
  0xae   : > { %p1197_p4 = scmp.ne.s32.totalorder %s1568_s23, %s1196_s22  ;;  %s1201_s10 = sshll.u32 %s1299_s9, 4  ;;  %s1202_s10 = int_to_ptr.vmem [resolvable:$false] %s1201_s10 }
  0xaf   : > { %s1203_s20 = scalar_lea.vmem %s1202_s10, 256  ;;  %p1204_p10 = scmp.lt.s32.totalorder %s1568_s23, %s1202_s10 }
  0xb0   : > { %p1199_p13 = pnand %p1197_p4, %p1183_p8  ;;  %p1205_p1 = scmp.lt.s32.totalorder %s1203_s20, %s1196_s22 }
  0xb2   : > { %p1200_p11 = pneg %p1199_p13  ;;  %p1206_p3 = por %p1205_p1, %p1204_p10 }
  0xb4   : > { %p1207_p2 = pnand %p1206_p3, %p1200_p11 }
  0xb6   : > { %1210 = shalt.err (!%p1207_p2)
}
  0xb7   : > { %930 = dma.hbm_to_vmem [thread:$0]  (!%p1572_p12), %s1566_s14, 128, %s1568_s23, %s293_s28  }
  0xb8   : > { %p1711_p0 = scmp.ne.s32.totalorder %s1702_s8, 0 }
  0xb9   : > { %s1604_s12 = sand.u32 (!%p1711_p0), 1, %s1281_s25  }
  0xba   : > { %312 = sbr.rel (%p1711_p0) target bundleno = 1103 (0x44f), region = 48  ;;  %s790_s29 = sshll.u32 (!%p1711_p0), %s1604_s12, 3 }
  0xbb   : > { %s315_s17 = scalar_lea.sflag (!%p1711_p0), [#allocation3], %s1604_s12  ;;  %s318_s13 = scalar_lea.vmem (!%p1711_p0), [#allocation2], %s790_s29 }
  0xc1   : > { %1256 = dma.done.wait (%p1547_p6), %s315_s17, 128  }
  0xc2   : > { %1258 = vsyncadd (%p1547_p6), %s315_s17, 4294967168  ;;  %p1712_p10 = scmp.eq.s32.totalorder %s1365_s30, 0 }
  0xc4   : > { %1260 = dma.done.wait (%p1712_p10), [#allocation6], 32   ;;  %p1713_p11 = pmov %p1712_p10 }
  0xc5   : > { %p1714_p12 = pmov %p1712_p10 }
  0xc6   : > { %1262 = vsyncadd (%p1713_p11), [#allocation6], 4294967264 }
  0xc7   : > { %1264 = dma.done.wait (%p1714_p12), [#allocation9], 1040   ;;  %p1715_p8 = pmov %p1712_p10 }
  0xc9   : > { %1266 = vsyncadd (%p1715_p8), [#allocation9], 4294966256  ;;  %p1716_p5 = pmov %p1715_p8 }
  0xcb   : > { %1268 = dma.done.wait (%p1716_p5), [#allocation12], 1040   ;;  %p1717_p7 = pmov %p1716_p5 }
  0xcc   : > { %v1300_v0 = vmov 0   ;;  %v1301_v1 = vmov 0.0   ;;  %v374_v2 = vld [vmem:[%s318_s13] sm:$0xff]  ;;  %v993_v3 = vld [vmem:[#allocation8] sm:$0xff]   ;;  %vm1302_vm0 = vmmov 0   ;;  %s797_s8 = sshll.u32 %s1604_s12, 2 }
  0xcd   : > { %1270 = vsyncadd (%p1717_p7), [#allocation12], 4294966256  ;;  %992 = vset.pattern.permute.xlu0 %v1300_v0  ;;  %840 = vmatprep.subr.bf16.mxu0 %v1301_v1  ;;  %v994_v4 = vld [vmem:[#allocation8 + $0x8] sm:$0xff]   ;;  %v995_v5 = vld [vmem:[#allocation8 + $0x10] sm:$0xff]   ;;  %s819_s21 = sshll.u32 %s1365_s30, 6  ;;  %s372_s14 = scalar_lea.vmem [#allocation14], %s797_s8 }
  0xce   : > { %860 = vmatprep.subr.bf16.mxu1 %v1301_v1  ;;  %378 = vperm.xlu0 %992, %v374_v2   ;;  %v996_v6 = vld [vmem:[#allocation8 + $0x18] sm:$0xff]   ;;  %v997_v7 = vld [vmem:[#allocation8 + $0x20] sm:$0xff]   ;;  %v998_v8 = vld [vmem:[#allocation8 + $0x28] sm:$0xff]   ;;  %s651_s23 = sshll.u32 %s372_s14, 4  ;;  %vm635_vm2 = vcmask 257024   ;;  %s1647_s22 = scalar_lea.hbm %s1698_s7, %s819_s21  ;;  %s1649_s23 = int_to_ptr.vmem [resolvable:$true] %s651_s23 }
  0xcf   : > { %841 = vmatpush3.bf16.msra.mxu0 %v993_v3  ;;  %856 = vmatprep.mubr.msk.bf16.mxu0 %vm1302_vm0, %v1301_v1  ;;  %v999_v9 = vld [vmem:[#allocation8 + $0x30] sm:$0xff]   ;;  %v1000_v10 = vld [vmem:[#allocation8 + $0x38] sm:$0xff]   ;;  %v800_v19 = vld [vmem:[#allocation10] ss:$0 sm:$0xff]  ;;  %s638_s30 = scalar_lea.sflag [#allocation4], %s1604_s12  ;;  %s1211_s9 = scalar_lea.vmem %s1649_s23, 64 }
  0xd0   : > { %842 = vmatprep.subr.bf16.mxu0 %v1301_v1  ;;  %876 = vmatprep.mubr.msk.bf16.mxu1 %vm1302_vm0, %v1301_v1  ;;  %v798_v11 = vld [vmem:[#allocation5] ss:$0 sm:$0xff]  ;;  %v799_v12 = vld [vmem:[#allocation7] ss:$0 sm:$0xff]  ;;  %v809_v24 = vld [vmem:[#allocation11] ss:$0 sm:$0xff]  ;;  %p1212_p6 = scmp.ne.s32.totalorder %s1649_s23, %s1211_s9 }
  0xd1   : > { %v1001_v28 = vld [vmem:[#allocation13] sm:$0xff]   ;;  %v1002_v29 = vld [vmem:[#allocation13 + $0x8] sm:$0xff]   ;;  %v1003_v30 = vld [vmem:[#allocation13 + $0x10] sm:$0xff]   ;;  %p1718_p9 = scmp.ne.s32.totalorder %s1708_s15, 0  ;;  %s1303_s10 = smov [#allocation14]  }
  0xd2   : > { %861 = vmatpush3.bf16.msra.mxu1 %v1001_v28  ;;  %v1004_v31 = vld [vmem:[#allocation13 + $0x18] sm:$0xff]   ;;  %v1005_v36 = vld [vmem:[#allocation13 + $0x20] sm:$0xff]   ;;  %v1006_v37 = vld [vmem:[#allocation13 + $0x28] sm:$0xff]   ;;  %s1215_s20 = sshll.u32 %s1303_s10, 4  ;;  %s1216_s20 = int_to_ptr.vmem [resolvable:$false] %s1215_s20 }
  0xd3   : > { %843 = vmatpush3.bf16.msra.mxu0 %v994_v4  ;;  %862 = vmatprep.subr.bf16.mxu1 %v1301_v1  ;;  %v1007_v38 = vld [vmem:[#allocation13 + $0x30] sm:$0xff]   ;;  %v1008_v39 = vld [vmem:[#allocation13 + $0x38] sm:$0xff]   ;;  %p1213_p4 = pnand %p1212_p6, %p1718_p9  ;;  %s1217_s29 = scalar_lea.vmem %s1216_s20, 128 }
  0xd4   : > { %844 = vmatprep.subr.bf16.mxu0 %v1301_v1  ;;  %p1218_p1 = scmp.lt.s32.totalorder %s1649_s23, %s1216_s20  ;;  %p1219_p3 = scmp.lt.s32.totalorder %s1217_s29, %s1211_s9 }
  0xd5   : > { %p1214_p13 = pneg %p1213_p4 }
  0xd6   : > { %863 = vmatpush3.bf16.msra.mxu1 %v1002_v29  ;;  %p1220_p2 = por %p1219_p3, %p1218_p1 }
  0xd7   : > { %845 = vmatpush3.bf16.msra.mxu0 %v995_v5  ;;  %864 = vmatprep.subr.bf16.mxu1 %v1301_v1 }
  0xd8   : > { %846 = vmatprep.subr.bf16.mxu0 %v1301_v1  ;;  %p1221_p0 = pnand %p1220_p2, %p1214_p13 }
  0xda   : > { %865 = vmatpush3.bf16.msra.mxu1 %v1003_v30 }
  0xdb   : > { %847 = vmatpush3.bf16.msra.mxu0 %v996_v6  ;;  %866 = vmatprep.subr.bf16.mxu1 %v1301_v1 }
  0xdc   : > { %848 = vmatprep.subr.bf16.mxu0 %v1301_v1 }
  0xde   : > { %867 = vmatpush3.bf16.msra.mxu1 %v1004_v31 }
  0xdf   : > { %849 = vmatpush3.bf16.msra.mxu0 %v997_v7  ;;  %868 = vmatprep.subr.bf16.mxu1 %v1301_v1 }
  0xe0   : > { %850 = vmatprep.subr.bf16.mxu0 %v1301_v1 }
  0xe2   : > { %869 = vmatpush3.bf16.msra.mxu1 %v1005_v36 }
  0xe3   : > { %851 = vmatpush3.bf16.msra.mxu0 %v998_v8  ;;  %870 = vmatprep.subr.bf16.mxu1 %v1301_v1 }
  0xe4   : > { %852 = vmatprep.subr.bf16.mxu0 %v1301_v1 }
  0xe6   : > { %871 = vmatpush3.bf16.msra.mxu1 %v1006_v37 }
  0xe7   : > { %853 = vmatpush3.bf16.msra.mxu0 %v999_v9  ;;  %872 = vmatprep.subr.bf16.mxu1 %v1301_v1 }
  0xe8   : > { %854 = vmatprep.subr.bf16.mxu0 %v1301_v1 }
  0xea   : > { %873 = vmatpush3.bf16.msra.mxu1 %v1007_v38 }
  0xeb   : > { %855 = vmatpush3.bf16.msra.mxu0 %v1000_v10  ;;  %874 = vmatprep.subr.bf16.mxu1 %v1301_v1 }
  0xee   : > { %875 = vmatpush3.bf16.msra.mxu1 %v1008_v39 }
 0x14d   : > { %v379_v13 = vpop.permute.xlu0 %378 }
 0x14e   : > { %v387_v14 = vmul.f32 %v798_v11, %v379_v13 }
 0x150   : > { %v395_v15 = vadd.f32 %v799_v12, %v387_v14 }
 0x152   : > { %vm396_vm1 = vcmp.gt.f32.partialorder %v395_v15, 0.0  ;;  %v397_v16 = vmul.f32 0.1, %v395_v15 }
 0x154   : > { %v398_v17 = vsel %vm396_vm1, %v395_v15, %v397_v16 }
 0x155   : > { %v399_v18 = vpack.c.bf16 %v398_v17, %v398_v17 }
 0x157   : > { %857 = vmatmul.mubr.bf16.vlgmr.msra.gmra.mrb[0].mxu0 %v399_v18 }
 0x22a   : > { %v505_v20 = vpop.f32.mrb[0].mxu0 }
 0x22b   : > { %v506_v21 = vadd.f32 %v800_v19, %v505_v20  ;;  %v858_v22 = vpop.f32.mrb[1].mxu0 }
 0x22c   : > { %v508_v23 = vpop.f32.mrb[2].mxu0 }
 0x22d   : > { %v511_v25 = vadd.f32 %v506_v21, %v398_v17  ;;  %v859_v26 = vpop.f32.mrb[3].mxu0 }
 0x22f   : > { %v519_v27 = vadd.f32 %v809_v24, %v511_v25 }
 0x231   : > { %520 = vmax.xlane.f32.xlu0 %v519_v27 }
 0x2be   : > { %v521_v32 = vpop.xlane.xlu0 %520 }
 0x2bf   : > { %v522_v33 = vsub.f32 %v519_v27, %v521_v32 }
 0x2c1   : > { %v523_v34 = vmul.f32 1.442695, %v522_v33 }
 0x2c3   : > { %1009 = vpow2.f32 %v523_v34 }
 0x2cd   : > { %v1010_v35 = vpop.eup %1009 }
 0x2ce   : > { %525 = vadd.xlane.f32.xlu1 %v1010_v35 }
 0x35b   : > { %v526_v40 = vpop.xlane.xlu1 %525 }
 0x35c   : > { %1011 = vrcp.f32 %v526_v40 }
 0x366   : > { %v1012_v41 = vpop.eup %1011 }
 0x367   : > { %v528_v42 = vmul.f32 %v1012_v41, %v1010_v35 }
 0x369   : > { %v529_v43 = vpack.c.bf16 %v528_v42, %v528_v42 }
 0x36b   : > { %877 = vmatmul.mubr.bf16.vlgmr.msra.gmra.mrb[0].mxu1 %v529_v43 }
 0x43e   : > { %v628_v44 = vpop.f32.mrb[0].mxu1 }
 0x43f   : > { %v634_v45 = vpack.c.bf16 %v628_v44, %v628_v44  ;;  %v878_v46 = vpop.f32.mrb[1].mxu1 }
 0x440   : > { %v631_v47 = vpop.f32.mrb[2].mxu1 }
 0x441   : > { %v879_v48 = vpop.f32.mrb[3].mxu1  ;;  %636 = vst.msk [vmem:[%s372_s14] sm:$0xf] %vm635_vm2, %v634_v45 }
 0x442   : > { %1224 = shalt.err (!%p1221_p0)
}
 0x443   : > { %s1225_s12 = scalar_lea.hbm %s1647_s22, 64  ;;  %s1229_s8 = scalar_lea.hbm %s1698_s7, 128 }
 0x444   : > { %p1226_p10 = scmp.ne.s32.totalorder %s1647_s22, %s1225_s12  ;;  %p1230_p8 = scmp.lt.u32.totalorder %s1647_s22, %s1698_s7 }
 0x445   : > { %p1231_p5 = scmp.lt.u32.totalorder %s1229_s8, %s1225_s12  ;;  %p1233_p6 = scmp.lt.u32.totalorder %s1225_s12, %s1647_s22 }
 0x446   : > { %p1227_p11 = pnand %p1226_p10, %p1718_p9 }
 0x447   : > { %p1232_p7 = por %p1231_p5, %p1230_p8 }
 0x448   : > { %p1228_p12 = pneg %p1227_p11 }
 0x449   : > { %p1234_p4 = por %p1233_p6, %p1232_p7 }
 0x44b   : > { %p1235_p13 = pnand %p1234_p4, %p1228_p12 }
 0x44d   : > { %1238 = shalt.err (!%p1235_p13)
}
 0x44e   : > { %906 = dma.vmem_to_hbm [thread:$0]  (%p1718_p9), %s1649_s23, 64, %s1647_s22, %s638_s30  }
 0x44f PF: > { %s663_s11 = sand.u32 1, %s1277_s24   ;;  %p1719_p1 = scmp.ne.s32.totalorder %s1709_s18, 0 }
 0x450   : > { %p1720_p3 = scmp.ge.s32.totalorder %s1289_s27, 2  ;;  %s664_s28 = scalar_lea.sflag [#allocation4], %s663_s11 }
 0x452   : > { %p932_p2 = pnand %p1720_p3, %p1719_p1 }
 0x454   : > { %1272 = dma.done.wait (!%p932_p2), %s664_s28, 64  }
 0x455   : > { %1274 = vsyncadd (!%p932_p2), %s664_s28, 4294967232  ;;  %p23_p0 = scmp.ge.s32.totalorder %s1528_s19, 4   ;;  %s1721_s24 = smov %s1281_s25 }
 0x456   : > { %s1722_s25 = smov %s1285_s26  ;;  %s1723_s26 = smov %s1539_s16 }
 0x457   : > { %s1724_s27 = smov %s1528_s19  ;;  %25 = sbr.rel (!%p23_p0) target bundleno = 8 (0x8), region = 117 }
 0x45e   :  { %669 = vsyncpa [#allocation3], 1 }
 0x45f   :  { %671 = vsyncpa [#allocation3 + $0x1], 1 }
 0x460   :  { %672 = vsyncpa [#allocation6], 1 }
 0x461   :  { %673 = vsyncpa [#allocation9], 1 }
 0x462   :  { %674 = vsyncpa [#allocation12], 1 }
 0x463   :  { %675 = vsyncpa [#allocation4], 1 }
 0x464   :  { %677 = vsyncpa [#allocation4 + $0x1], 1 }

</bundles_post_ra>
